<compile_context>
chip_gen: v7x
topology: tpu7x:2x2x1
jax: 0.10.0
libtpu: 0.0.40
codegen_flags: <defaults>
</compile_context>

<pallas_src>
import math

import numpy as np
import jax
import jax.numpy as jnp
from jax import lax
from jax.experimental import pallas as pl
from jax.experimental.pallas import tpu as pltpu

MUL = 8                      # multiplicity of every irrep block
DIM_IN = 4 * MUL             # 8x0e + 8x1e = 32
DIM_EDGE = 4                 # 1x0e + 1x1e
DIM_SC = 32                  # fc_neurons[0]
DIM_HID = 32                 # fc_neurons[1]
W_NUMEL = 5 * MUL            # 40 per-edge TP weights
DIM_OUT = 4 * MUL            # 32
TP_ROWS = 11 * MUL           # 88 depthwise-TP output channels (pre-simplify)

INV_SQRT3 = 1.0 / math.sqrt(3.0)
INV_SQRT2 = 1.0 / math.sqrt(2.0)
EPS = 1e-5

# packed parameter slabs
WS_ROWS, WS_COLS = 136, 88   # wr1t(0:32) | wr2t(32:72) | wl_fused(72:104) | px(104:136)
VS_ROWS = 184                # br1|lng|lnb (32 each) | roff(40) | bl(8) | elw_s(8) | elb(8) | gv_u(24)

_NT = (((1,), (1,)), ((), ()))   # contract dim-1 of both operands (A @ B.T), standard MXU NT form


def _round_up(a, b):
    return ((a + b - 1) // b) * b


def _sep_fctp_kernel(x_ref, y_ref, s_ref, w_ref, v_ref, o_ref, tp_ref):
    """One edge tile.  Internals are channel-major [channels, TE] (lane-dense)."""
    f32 = jnp.float32

    # ---- packed params (constant block index -> DMA'd once) ----
    wr1t = w_ref[0:32, 0:32]        # [hid, in]   RadialProfile Linear 1 (transposed)
    wr2t = w_ref[32:72, 0:32]       # [40, hid]   RadialProfile Linear 2 (transposed, path-const folded)
    wlf = w_ref[72:104, :]          # [32, 88]    fused LinearRS, output rows in e3nn u-major order
    px = w_ref[104:136, 0:32]       # [32, 32]    e3nn u-major cols -> component-major rows permutation
    br1 = v_ref[0:32, :]
    lng = v_ref[32:64, :]
    lnb = v_ref[64:96, :]
    roff = v_ref[96:136, :]
    bl = v_ref[136:144, :]
    elws = v_ref[144:152, :]
    elb = v_ref[152:160, :]
    gvu = v_ref[160:184, :]         # [24,1] vector affine gains, u-major (elw[8+u] repeated x3)

    x_e = x_ref[...]                # [TE, 32] edge-major node feats (e3nn layout)
    s_e = s_ref[...]                # [TE, 32] edge-major radial scalars
    y = y_ref[...]                  # [4,  TE] channel-major edge_attr (tiny wrapper transpose)

    # ---- 1) RadialProfile: Linear + LayerNorm + SiLU + Linear (+offset) --------
    # NT dot_general folds the [TE,32] -> [32,TE] relayout into the matmul itself.
    h = lax.dot_general(wr1t, s_e, _NT, preferred_element_type=f32) + br1        # [32, TE]
    mu = jnp.mean(h, axis=0, keepdims=True)
    d = h - mu
    var = jnp.mean(d * d, axis=0, keepdims=True)          # two-pass variance (no cancellation)
    h = d * lax.rsqrt(var + EPS) * lng + lnb
    h = h * jax.nn.sigmoid(h)                              # SiLU
    w = jnp.dot(wr2t, h, preferred_element_type=f32) + roff                      # [40, TE]

    # ---- 2) depthwise tensor product ('uvu', per-edge weights) -----------------
    # px simultaneously transposes x and reorders its vector block to component-major.
    x_cm = lax.dot_general(px, x_e, _NT, preferred_element_type=f32)             # [32, TE]
    x0 = x_cm[0:8]
    xv0 = x_cm[8:16]
    xv1 = x_cm[16:24]
    xv2 = x_cm[24:32]
    y0 = y[0:1]
    yv0 = y[1:2]
    yv1 = y[2:3]
    yv2 = y[3:4]
    w0 = w[0:8]                      # instr0: 0e x 0e -> 0e
    w1 = w[8:16]                     # instr1: 0e x 1e -> 1e
    w2 = w[16:24]                    # instr2: 1e x 0e -> 1e
    w3 = w[24:32]                    # instr3: 1e x 1e -> 0e  (1/sqrt(3) pre-folded)
    w4 = w[32:40]                    # instr4: 1e x 1e -> 1e  (1/sqrt(2) pre-folded)

    # TP outputs written straight into the fused-LinearRS input scratch
    # row order: [s0 | s1 | (a,b,c) m=0 | (a,b,c) m=1 | (a,b,c) m=2]
    tp_ref[0:8, :] = x0 * y0 * w0
    tp_ref[8:16, :] = (xv0 * yv0 + xv1 * yv1 + xv2 * yv2) * w3
    tp_ref[16:24, :] = x0 * yv0 * w1
    tp_ref[24:32, :] = xv0 * y0 * w2
    # TODO(synk): cross-product (1e x 1e -> 1e) sign/normalization is validated only
    # against the in-script JAX reference, not against a real e3nn 'uvu' instance.
    tp_ref[32:40, :] = (xv1 * yv2 - xv2 * yv1) * w4
    tp_ref[40:48, :] = x0 * yv1 * w1
    tp_ref[48:56, :] = xv1 * y0 * w2
    tp_ref[56:64, :] = (xv2 * yv0 - xv0 * yv2) * w4
    tp_ref[64:72, :] = x0 * yv2 * w1
    tp_ref[72:80, :] = xv2 * y0 * w2
    tp_ref[80:88, :] = (xv0 * yv1 - xv1 * yv0) * w4

    # ---- 3) LinearRS fused into a single [32,88] x [88,TE] matmul --------------
    lin = jnp.dot(wlf, tp_ref[...], preferred_element_type=f32)                  # [32, TE]
    ls = lin[0:8] + bl               # scalar channels (LinearRS bias is 0e-only)
    lv = lin[8:32]                   # vector channels, u-major rows (= final e3nn order)

    # ---- 4) EquivariantLayerNormV2 ('component', affine) -----------------------
    fs = ls - jnp.mean(ls, axis=0, keepdims=True)
    ns = jnp.mean(fs * fs, axis=0, keepdims=True)
    fs = fs * lax.rsqrt(ns + EPS) * elws + elb
    nv = jnp.mean(lv * lv, axis=0, keepdims=True)          # mean over all (u, m)
    fv = lv * (lax.rsqrt(nv + EPS) * gvu)

    # ---- 5) single edge-major store; the [32,TE]->[TE,32] transpose uses the idle XLU
    o_ref[...] = jnp.concatenate([fs, fv], axis=0).T


def pack_params(p):
    """Pre-fold constants / permutations and pack the 11 params into 2 slabs (done once)."""
    f32 = np.float32
    wr1t = np.asarray(p['wr1'], f32).T                       # [hid, in]
    wr2t = np.asarray(p['wr2'], f32).T.copy()                # [40, hid]
    roff = np.asarray(p['roff'], f32).reshape(-1).copy()     # [40]
    scale = np.ones((W_NUMEL,), f32)
    scale[24:32] = INV_SQRT3                                 # instr3 path constant
    scale[32:40] = INV_SQRT2                                 # instr4 path constant
    wr2t *= scale[:, None]
    roff *= scale

    # fused LinearRS weight: block-diagonal, output rows in final e3nn u-major order
    wl0t = np.asarray(p['wl0'], f32).T                       # [8, 16]
    wl1 = np.asarray(p['wl1'], f32)                          # [24, 8]
    wlf = np.zeros((DIM_OUT, TP_ROWS), f32)
    wlf[0:8, 0:16] = wl0t
    for u in range(MUL):
        for m in range(3):
            wlf[8 + 3 * u + m, 16 + 24 * m:40 + 24 * m] = wl1[:, u]

    # input permutation: x column 8+3u+m (u-major) -> internal row 8+8m+u (component-major)
    px = np.zeros((DIM_IN, DIM_IN), f32)
    for u in range(MUL):
        px[u, u] = 1.0
        for m in range(3):
            px[8 + 8 * m + u, 8 + 3 * u + m] = 1.0

    wslab = np.zeros((WS_ROWS, WS_COLS), f32)
    wslab[0:32, 0:32] = wr1t
    wslab[32:72, 0:32] = wr2t
    wslab[72:104, :] = wlf
    wslab[104:136, 0:32] = px

    elw = np.asarray(p['elw'], f32).reshape(-1)
    vslab = np.concatenate([
        np.asarray(p['br1'], f32).reshape(-1),
        np.asarray(p['lng'], f32).reshape(-1),
        np.asarray(p['lnb'], f32).reshape(-1),
        roff,
        np.asarray(p['bl'], f32).reshape(-1),
        elw[:MUL],
        np.asarray(p['elb'], f32).reshape(-1),
        np.repeat(elw[MUL:], 3),                             # u-major vector gains
    ]).astype(f32).reshape(VS_ROWS, 1)
    return jnp.asarray(wslab), jnp.asarray(vslab)


def separable_fctp_forward(node_input, edge_attr, edge_scalars, packed, *, tile_edges=2048):
    """node_input [E,32], edge_attr [E,4], edge_scalars [E,32] (e3nn layouts) -> [E,32]."""
    wslab, vslab = packed
    E = node_input.shape[0]
    y_cm = edge_attr.T          # only remaining wrapper relayout (~16 B/edge; negligible)

    # Tile selection: lane-dense multiple of 128 (sweep 2048-8192), no >=2-tile cap
    # (only helps multi-TC parts).  Exact single tile when E fits and is 8-aligned;
    # otherwise the ragged tail is handled by Pallas boundary-block masking (no pad).
    tile = max(128, _round_up(tile_edges, 128))
    te = E if (E <= tile and E % 8 == 0) else tile
    n_tiles = pl.cdiv(E, te)

    return pl.pallas_call(
        _sep_fctp_kernel,
        out_shape=jax.ShapeDtypeStruct((E, DIM_OUT), jnp.float32),
        grid=(n_tiles,),
        in_specs=[
            pl.BlockSpec((te, DIM_IN), lambda i: (i, 0)),        # node_input, edge-major
            pl.BlockSpec((DIM_EDGE, te), lambda i: (0, i)),      # edge_attr, channel-major
            pl.BlockSpec((te, DIM_SC), lambda i: (i, 0)),        # edge_scalars, edge-major
            pl.BlockSpec((WS_ROWS, WS_COLS), lambda i: (0, 0)),  # weight slab (loaded once)
            pl.BlockSpec((VS_ROWS, 1), lambda i: (0, 0)),        # bias/scale slab (loaded once)
        ],
        out_specs=pl.BlockSpec((te, DIM_OUT), lambda i: (i, 0)),
        scratch_shapes=[pltpu.VMEM((TP_ROWS, te), jnp.float32)],
        compiler_params=pltpu.CompilerParams(dimension_semantics=("parallel",)),
        # TODO(synk): on v7x, profile and switch this axis to pltpu.CORE_PARALLEL (or an
        # explicit core_map split) if a single 'parallel' axis does not occupy both TCs.
    )(node_input, y_cm, edge_scalars, wslab, vslab)


def init_params(key):
    ks = jax.random.split(key, 10)

    def u(k, shape, fan_in):
        b = 1.0 / math.sqrt(fan_in)
        return jax.random.uniform(k, shape, jnp.float32, -b, b)

    return {
        'wr1': u(ks[0], (DIM_SC, DIM_HID), DIM_SC),      # RadialProfile Linear 1
        'br1': u(ks[1], (1, DIM_HID), DIM_SC),
        'lng': 1.0 + 0.1 * jax.random.normal(ks[2], (1, DIM_HID), jnp.float32),
        'lnb': 0.1 * jax.random.normal(ks[3], (1, DIM_HID), jnp.float32),
        'wr2': u(ks[4], (DIM_HID, W_NUMEL), DIM_HID),    # RadialProfile Linear 2 (bias=False)
        'roff': u(ks[5], (1, W_NUMEL), DIM_HID),         # RadialProfile offset
        'wl0': u(ks[6], (2 * MUL, MUL), 2 * MUL),        # LinearRS 0e path
        'wl1': u(ks[7], (3 * MUL, MUL), 3 * MUL),        # LinearRS 1e path
        'bl': jnp.zeros((1, MUL), jnp.float32),          # LinearRS bias (0e only)
        'elw': 1.0 + 0.1 * jax.random.normal(ks[8], (1, 2 * MUL), jnp.float32),
        'elb': 0.1 * jax.random.normal(ks[9], (1, MUL), jnp.float32),
    }


def reference_forward(node_input, edge_attr, edge_scalars, p):
    """Pure-JAX reference in e3nn (u-major) layout, HIGHEST-precision matmuls."""
    hp = jax.lax.Precision.HIGHEST
    E = node_input.shape[0]
    h = jnp.dot(edge_scalars, p['wr1'], precision=hp) + p['br1'][0]
    mu = h.mean(-1, keepdims=True)
    var = ((h - mu) ** 2).mean(-1, keepdims=True)
    h = (h - mu) / jnp.sqrt(var + EPS) * p['lng'][0] + p['lnb'][0]
    h = h * jax.nn.sigmoid(h)
    w = jnp.dot(h, p['wr2'], precision=hp) + p['roff'][0]

    x0 = node_input[:, :MUL]
    x1 = node_input[:, MUL:].reshape(E, MUL, 3)
    y0 = edge_attr[:, 0:1]
    y1 = edge_attr[:, 1:4]
    wi = [w[:, MUL * i: MUL * (i + 1)] for i in range(5)]
    o0 = x0 * y0 * wi[0]
    o1 = (x1 * y1[:, None, :]).sum(-1) * INV_SQRT3 * wi[3]
    o2 = x0[:, :, None] * y1[:, None, :] * wi[1][:, :, None]
    o3 = x1 * y0[:, :, None] * wi[2][:, :, None]
    cr = jnp.cross(x1, jnp.broadcast_to(y1[:, None, :], x1.shape))
    o4 = cr * INV_SQRT2 * wi[4][:, :, None]
    scal = jnp.concatenate([o0, o1], axis=-1)
    vec = jnp.concatenate([o2, o3, o4], axis=1)
    ls = jnp.dot(scal, p['wl0'], precision=hp) + p['bl'][0]
    lv = jnp.einsum('eum,uw->ewm', vec, p['wl1'], precision=hp)
    fs = ls - ls.mean(-1, keepdims=True)
    ns = (fs ** 2).mean(-1, keepdims=True)
    fs = fs / jnp.sqrt(ns + EPS) * p['elw'][0, :MUL] + p['elb'][0]
    nv = (lv ** 2).mean(-1).mean(-1, keepdims=True)
    fv = lv * (1.0 / jnp.sqrt(nv + EPS) * p['elw'][0, MUL:])[:, :, None]
    return jnp.concatenate([fs, fv.reshape(E, 3 * MUL)], axis=-1)


if __name__ == "__main__":
    key = jax.random.PRNGKey(0)
    kp, kd = jax.random.split(key)
    params = init_params(kp)
    packed = pack_params(params)

    # (E, tile): exact single tile / single ragged tile / multi-tile with masked tail.
    for E, tile in ((16, 2048), (200, 2048), (300, 128)):
        k1, k2, k3 = jax.random.split(jax.random.fold_in(kd, E), 3)
        node_input = jax.random.normal(k1, (E, DIM_IN), jnp.float32)     # per-edge node feats
        edge_attr = jax.random.normal(k2, (E, DIM_EDGE), jnp.float32)    # spherical harmonics
        edge_scalars = jax.random.normal(k3, (E, DIM_SC), jnp.float32)   # radial embedding

        out = separable_fctp_forward(node_input, edge_attr, edge_scalars, packed,
                                     tile_edges=tile)
        out = jax.block_until_ready(out)
        assert out.shape == (E, DIM_OUT)

        ref = reference_forward(node_input, edge_attr, edge_scalars, params)
        max_err = float(jnp.max(jnp.abs(out - ref)))
        assert bool(jnp.allclose(out, ref, atol=2e-3, rtol=2e-3)), (
            f"kernel mismatch vs reference (E={E}, max_err={max_err})")

    print("KERNEL_OK")
</pallas_src>

<mosaic_0001>
module attributes {stable_mosaic.version = 11 : i64} {
  func.func @_sep_fctp_kernel(%arg0: i32, %arg1: memref<16x32xf32, #tpu.memory_space<vmem>>, %arg2: memref<4x16xf32, #tpu.memory_space<vmem>>, %arg3: memref<16x32xf32, #tpu.memory_space<vmem>>, %arg4: memref<136x88xf32, #tpu.memory_space<vmem>>, %arg5: memref<184x1xf32, #tpu.memory_space<vmem>>, %arg6: memref<16x32xf32, #tpu.memory_space<vmem>>, %arg7: memref<88x16xf32, #tpu.memory_space<vmem>>) attributes {dimension_semantics = [#tpu.dimension_semantics<parallel>], iteration_bounds = array<i64: 1>, scalar_prefetch = 0 : i64, scratch_operands = 1 : i64, tpu.core_type = #tpu.core_type<tc>, window_params = [{transform_indices = @transform_0, window_bounds = array<i64: 16, 32>}, {transform_indices = @transform_1, window_bounds = array<i64: 4, 16>}, {transform_indices = @transform_2, window_bounds = array<i64: 16, 32>}, {pipeline_mode = #tpu.pipeline_mode<synchronous>, transform_indices = @transform_3, window_bounds = array<i64: 136, 88>}, {pipeline_mode = #tpu.pipeline_mode<synchronous>, transform_indices = @transform_4, window_bounds = array<i64: 184, 1>}, {transform_indices = @transform_5, window_bounds = array<i64: 16, 32>}]} {
    %c0 = arith.constant 0 : index
    %c0_0 = arith.constant 0 : index
    %0 = vector.load %arg4[%c0, %c0_0] : memref<136x88xf32, #tpu.memory_space<vmem>>, vector<32x32xf32>
    %c32 = arith.constant 32 : index
    %c0_1 = arith.constant 0 : index
    %1 = vector.load %arg4[%c32, %c0_1] : memref<136x88xf32, #tpu.memory_space<vmem>>, vector<40x32xf32>
    %c72 = arith.constant 72 : index
    %c0_2 = arith.constant 0 : index
    %2 = vector.load %arg4[%c72, %c0_2] : memref<136x88xf32, #tpu.memory_space<vmem>>, vector<32x88xf32>
    %c104 = arith.constant 104 : index
    %c0_3 = arith.constant 0 : index
    %3 = vector.load %arg4[%c104, %c0_3] : memref<136x88xf32, #tpu.memory_space<vmem>>, vector<32x32xf32>
    %c0_4 = arith.constant 0 : index
    %c0_5 = arith.constant 0 : index
    %4 = vector.load %arg5[%c0_4, %c0_5] : memref<184x1xf32, #tpu.memory_space<vmem>>, vector<32x1xf32>
    %c32_6 = arith.constant 32 : index
    %c0_7 = arith.constant 0 : index
    %5 = vector.load %arg5[%c32_6, %c0_7] : memref<184x1xf32, #tpu.memory_space<vmem>>, vector<32x1xf32>
    %c64 = arith.constant 64 : index
    %c0_8 = arith.constant 0 : index
    %6 = vector.load %arg5[%c64, %c0_8] : memref<184x1xf32, #tpu.memory_space<vmem>>, vector<32x1xf32>
    %c96 = arith.constant 96 : index
    %c0_9 = arith.constant 0 : index
    %7 = vector.load %arg5[%c96, %c0_9] : memref<184x1xf32, #tpu.memory_space<vmem>>, vector<40x1xf32>
    %c136 = arith.constant 136 : index
    %c0_10 = arith.constant 0 : index
    %8 = vector.load %arg5[%c136, %c0_10] : memref<184x1xf32, #tpu.memory_space<vmem>>, vector<8x1xf32>
    %c144 = arith.constant 144 : index
    %c0_11 = arith.constant 0 : index
    %9 = vector.load %arg5[%c144, %c0_11] : memref<184x1xf32, #tpu.memory_space<vmem>>, vector<8x1xf32>
    %c152 = arith.constant 152 : index
    %c0_12 = arith.constant 0 : index
    %10 = vector.load %arg5[%c152, %c0_12] : memref<184x1xf32, #tpu.memory_space<vmem>>, vector<8x1xf32>
    %c160 = arith.constant 160 : index
    %c0_13 = arith.constant 0 : index
    %11 = vector.load %arg5[%c160, %c0_13] : memref<184x1xf32, #tpu.memory_space<vmem>>, vector<24x1xf32>
    %c0_14 = arith.constant 0 : index
    %c0_15 = arith.constant 0 : index
    %12 = vector.load %arg1[%c0_14, %c0_15] : memref<16x32xf32, #tpu.memory_space<vmem>>, vector<16x32xf32>
    %c0_16 = arith.constant 0 : index
    %c0_17 = arith.constant 0 : index
    %13 = vector.load %arg3[%c0_16, %c0_17] : memref<16x32xf32, #tpu.memory_space<vmem>>, vector<16x32xf32>
    %c0_18 = arith.constant 0 : index
    %c0_19 = arith.constant 0 : index
    %14 = vector.load %arg2[%c0_18, %c0_19] : memref<4x16xf32, #tpu.memory_space<vmem>>, vector<4x16xf32>
    %cst = arith.constant dense<0.000000e+00> : vector<32x16xf32>
    %15 = tpu.matmul %0, %13, %cst {dimension_numbers = #tpu.dot_dimension_numbers<[1], [1], [0], [0], [0, 0, 1, 0], [], []>} : vector<32x32xf32>, vector<16x32xf32>, vector<32x16xf32> -> vector<32x16xf32>
    %16 = vector.broadcast %4 : vector<32x1xf32> to vector<32x16xf32>
    %17 = arith.addf %15, %16 : vector<32x16xf32>
    %cst_20 = arith.constant dense<0.000000e+00> : vector<16xf32>
    %18 = vector.multi_reduction <add>, %17, %cst_20 [0] : vector<32x16xf32> to vector<16xf32>
    %19 = vector.shape_cast %18 : vector<16xf32> to vector<1x16xf32>
    %cst_21 = arith.constant 3.200000e+01 : f32
    %20 = vector.broadcast %cst_21 : f32 to vector<1x16xf32>
    %21 = arith.divf %19, %20 : vector<1x16xf32>
    %22 = vector.broadcast %21 : vector<1x16xf32> to vector<32x16xf32>
    %23 = arith.subf %17, %22 : vector<32x16xf32>
    %24 = arith.mulf %23, %23 : vector<32x16xf32>
    %cst_22 = arith.constant dense<0.000000e+00> : vector<16xf32>
    %25 = vector.multi_reduction <add>, %24, %cst_22 [0] : vector<32x16xf32> to vector<16xf32>
    %26 = vector.shape_cast %25 : vector<16xf32> to vector<1x16xf32>
    %cst_23 = arith.constant 3.200000e+01 : f32
    %27 = vector.broadcast %cst_23 : f32 to vector<1x16xf32>
    %28 = arith.divf %26, %27 : vector<1x16xf32>
    %cst_24 = arith.constant 9.99999974E-6 : f32
    %29 = vector.broadcast %cst_24 : f32 to vector<1x16xf32>
    %30 = arith.addf %28, %29 : vector<1x16xf32>
    %31 = math.rsqrt %30 : vector<1x16xf32>
    %32 = vector.broadcast %31 : vector<1x16xf32> to vector<32x16xf32>
    %33 = arith.mulf %23, %32 : vector<32x16xf32>
    %34 = vector.broadcast %5 : vector<32x1xf32> to vector<32x16xf32>
    %35 = arith.mulf %33, %34 : vector<32x16xf32>
    %36 = vector.broadcast %6 : vector<32x1xf32> to vector<32x16xf32>
    %37 = arith.addf %35, %36 : vector<32x16xf32>
    %38 = arith.negf %37 : vector<32x16xf32>
    %39 = math.exp %38 : vector<32x16xf32>
    %cst_25 = arith.constant 1.000000e+00 : f32
    %40 = vector.broadcast %cst_25 : f32 to vector<32x16xf32>
    %41 = arith.addf %40, %39 : vector<32x16xf32>
    %42 = arith.divf %40, %41 : vector<32x16xf32>
    %43 = arith.mulf %37, %42 : vector<32x16xf32>
    %cst_26 = arith.constant dense<0.000000e+00> : vector<40x16xf32>
    %44 = tpu.matmul %1, %43, %cst_26 {dimension_numbers = #tpu.dot_dimension_numbers<[1], [0], [0], [1], [0, 0, 1, 1], [], []>} : vector<40x32xf32>, vector<32x16xf32>, vector<40x16xf32> -> vector<40x16xf32>
    %45 = vector.broadcast %7 : vector<40x1xf32> to vector<40x16xf32>
    %46 = arith.addf %44, %45 : vector<40x16xf32>
    %cst_27 = arith.constant dense<0.000000e+00> : vector<32x16xf32>
    %47 = tpu.matmul %3, %12, %cst_27 {dimension_numbers = #tpu.dot_dimension_numbers<[1], [1], [0], [0], [0, 0, 1, 0], [], []>} : vector<32x32xf32>, vector<16x32xf32>, vector<32x16xf32> -> vector<32x16xf32>
    %48 = vector.extract_strided_slice %47 {offsets = [0, 0], sizes = [8, 16], strides = [1, 1]} : vector<32x16xf32> to vector<8x16xf32>
    %49 = vector.extract_strided_slice %47 {offsets = [8, 0], sizes = [8, 16], strides = [1, 1]} : vector<32x16xf32> to vector<8x16xf32>
    %50 = vector.extract_strided_slice %47 {offsets = [16, 0], sizes = [8, 16], strides = [1, 1]} : vector<32x16xf32> to vector<8x16xf32>
    %51 = vector.extract_strided_slice %47 {offsets = [24, 0], sizes = [8, 16], strides = [1, 1]} : vector<32x16xf32> to vector<8x16xf32>
    %52 = vector.extract_strided_slice %14 {offsets = [0, 0], sizes = [1, 16], strides = [1, 1]} : vector<4x16xf32> to vector<1x16xf32>
    %53 = vector.extract_strided_slice %14 {offsets = [1, 0], sizes = [1, 16], strides = [1, 1]} : vector<4x16xf32> to vector<1x16xf32>
    %54 = vector.extract_strided_slice %14 {offsets = [2, 0], sizes = [1, 16], strides = [1, 1]} : vector<4x16xf32> to vector<1x16xf32>
    %55 = vector.extract_strided_slice %14 {offsets = [3, 0], sizes = [1, 16], strides = [1, 1]} : vector<4x16xf32> to vector<1x16xf32>
    %56 = vector.extract_strided_slice %46 {offsets = [0, 0], sizes = [8, 16], strides = [1, 1]} : vector<40x16xf32> to vector<8x16xf32>
    %57 = vector.extract_strided_slice %46 {offsets = [8, 0], sizes = [8, 16], strides = [1, 1]} : vector<40x16xf32> to vector<8x16xf32>
    %58 = vector.extract_strided_slice %46 {offsets = [16, 0], sizes = [8, 16], strides = [1, 1]} : vector<40x16xf32> to vector<8x16xf32>
    %59 = vector.extract_strided_slice %46 {offsets = [24, 0], sizes = [8, 16], strides = [1, 1]} : vector<40x16xf32> to vector<8x16xf32>
    %60 = vector.extract_strided_slice %46 {offsets = [32, 0], sizes = [8, 16], strides = [1, 1]} : vector<40x16xf32> to vector<8x16xf32>
    %61 = vector.broadcast %52 : vector<1x16xf32> to vector<8x16xf32>
    %62 = arith.mulf %48, %61 : vector<8x16xf32>
    %63 = arith.mulf %62, %56 : vector<8x16xf32>
    %c0_28 = arith.constant 0 : index
    %c0_29 = arith.constant 0 : index
    %64 = vector.load %arg7[%c0_28, %c0_29] : memref<88x16xf32, #tpu.memory_space<vmem>>, vector<8x16xf32>
    tpu.vector_store %arg7[%c0_28, %c0_29], %63 {strides = array<i32>} : memref<88x16xf32, #tpu.memory_space<vmem>>, vector<8x16xf32>,
    %65 = vector.broadcast %53 : vector<1x16xf32> to vector<8x16xf32>
    %66 = arith.mulf %49, %65 : vector<8x16xf32>
    %67 = vector.broadcast %54 : vector<1x16xf32> to vector<8x16xf32>
    %68 = arith.mulf %50, %67 : vector<8x16xf32>
    %69 = arith.addf %66, %68 : vector<8x16xf32>
    %70 = vector.broadcast %55 : vector<1x16xf32> to vector<8x16xf32>
    %71 = arith.mulf %51, %70 : vector<8x16xf32>
    %72 = arith.addf %69, %71 : vector<8x16xf32>
    %73 = arith.mulf %72, %59 : vector<8x16xf32>
    %c8 = arith.constant 8 : index
    %c0_30 = arith.constant 0 : index
    %74 = vector.load %arg7[%c8, %c0_30] : memref<88x16xf32, #tpu.memory_space<vmem>>, vector<8x16xf32>
    tpu.vector_store %arg7[%c8, %c0_30], %73 {strides = array<i32>} : memref<88x16xf32, #tpu.memory_space<vmem>>, vector<8x16xf32>,
    %75 = vector.broadcast %53 : vector<1x16xf32> to vector<8x16xf32>
    %76 = arith.mulf %48, %75 : vector<8x16xf32>
    %77 = arith.mulf %76, %57 : vector<8x16xf32>
    %c16 = arith.constant 16 : index
    %c0_31 = arith.constant 0 : index
    %78 = vector.load %arg7[%c16, %c0_31] : memref<88x16xf32, #tpu.memory_space<vmem>>, vector<8x16xf32>
    tpu.vector_store %arg7[%c16, %c0_31], %77 {strides = array<i32>} : memref<88x16xf32, #tpu.memory_space<vmem>>, vector<8x16xf32>,
    %79 = vector.broadcast %52 : vector<1x16xf32> to vector<8x16xf32>
    %80 = arith.mulf %49, %79 : vector<8x16xf32>
    %81 = arith.mulf %80, %58 : vector<8x16xf32>
    %c24 = arith.constant 24 : index
    %c0_32 = arith.constant 0 : index
    %82 = vector.load %arg7[%c24, %c0_32] : memref<88x16xf32, #tpu.memory_space<vmem>>, vector<8x16xf32>
    tpu.vector_store %arg7[%c24, %c0_32], %81 {strides = array<i32>} : memref<88x16xf32, #tpu.memory_space<vmem>>, vector<8x16xf32>,
    %83 = vector.broadcast %55 : vector<1x16xf32> to vector<8x16xf32>
    %84 = arith.mulf %50, %83 : vector<8x16xf32>
    %85 = vector.broadcast %54 : vector<1x16xf32> to vector<8x16xf32>
    %86 = arith.mulf %51, %85 : vector<8x16xf32>
    %87 = arith.subf %84, %86 : vector<8x16xf32>
    %88 = arith.mulf %87, %60 : vector<8x16xf32>
    %c32_33 = arith.constant 32 : index
    %c0_34 = arith.constant 0 : index
    %89 = vector.load %arg7[%c32_33, %c0_34] : memref<88x16xf32, #tpu.memory_space<vmem>>, vector<8x16xf32>
    tpu.vector_store %arg7[%c32_33, %c0_34], %88 {strides = array<i32>} : memref<88x16xf32, #tpu.memory_space<vmem>>, vector<8x16xf32>,
    %90 = vector.broadcast %54 : vector<1x16xf32> to vector<8x16xf32>
    %91 = arith.mulf %48, %90 : vector<8x16xf32>
    %92 = arith.mulf %91, %57 : vector<8x16xf32>
    %c40 = arith.constant 40 : index
    %c0_35 = arith.constant 0 : index
    %93 = vector.load %arg7[%c40, %c0_35] : memref<88x16xf32, #tpu.memory_space<vmem>>, vector<8x16xf32>
    tpu.vector_store %arg7[%c40, %c0_35], %92 {strides = array<i32>} : memref<88x16xf32, #tpu.memory_space<vmem>>, vector<8x16xf32>,
    %94 = vector.broadcast %52 : vector<1x16xf32> to vector<8x16xf32>
    %95 = arith.mulf %50, %94 : vector<8x16xf32>
    %96 = arith.mulf %95, %58 : vector<8x16xf32>
    %c48 = arith.constant 48 : index
    %c0_36 = arith.constant 0 : index
    %97 = vector.load %arg7[%c48, %c0_36] : memref<88x16xf32, #tpu.memory_space<vmem>>, vector<8x16xf32>
    tpu.vector_store %arg7[%c48, %c0_36], %96 {strides = array<i32>} : memref<88x16xf32, #tpu.memory_space<vmem>>, vector<8x16xf32>,
    %98 = vector.broadcast %53 : vector<1x16xf32> to vector<8x16xf32>
    %99 = arith.mulf %51, %98 : vector<8x16xf32>
    %100 = vector.broadcast %55 : vector<1x16xf32> to vector<8x16xf32>
    %101 = arith.mulf %49, %100 : vector<8x16xf32>
    %102 = arith.subf %99, %101 : vector<8x16xf32>
    %103 = arith.mulf %102, %60 : vector<8x16xf32>
    %c56 = arith.constant 56 : index
    %c0_37 = arith.constant 0 : index
    %104 = vector.load %arg7[%c56, %c0_37] : memref<88x16xf32, #tpu.memory_space<vmem>>, vector<8x16xf32>
    tpu.vector_store %arg7[%c56, %c0_37], %103 {strides = array<i32>} : memref<88x16xf32, #tpu.memory_space<vmem>>, vector<8x16xf32>,
    %105 = vector.broadcast %55 : vector<1x16xf32> to vector<8x16xf32>
    %106 = arith.mulf %48, %105 : vector<8x16xf32>
    %107 = arith.mulf %106, %57 : vector<8x16xf32>
    %c64_38 = arith.constant 64 : index
    %c0_39 = arith.constant 0 : index
    %108 = vector.load %arg7[%c64_38, %c0_39] : memref<88x16xf32, #tpu.memory_space<vmem>>, vector<8x16xf32>
    tpu.vector_store %arg7[%c64_38, %c0_39], %107 {strides = array<i32>} : memref<88x16xf32, #tpu.memory_space<vmem>>, vector<8x16xf32>,
    %109 = vector.broadcast %52 : vector<1x16xf32> to vector<8x16xf32>
    %110 = arith.mulf %51, %109 : vector<8x16xf32>
    %111 = arith.mulf %110, %58 : vector<8x16xf32>
    %c72_40 = arith.constant 72 : index
    %c0_41 = arith.constant 0 : index
    %112 = vector.load %arg7[%c72_40, %c0_41] : memref<88x16xf32, #tpu.memory_space<vmem>>, vector<8x16xf32>
    tpu.vector_store %arg7[%c72_40, %c0_41], %111 {strides = array<i32>} : memref<88x16xf32, #tpu.memory_space<vmem>>, vector<8x16xf32>,
    %113 = vector.broadcast %54 : vector<1x16xf32> to vector<8x16xf32>
    %114 = arith.mulf %49, %113 : vector<8x16xf32>
    %115 = vector.broadcast %53 : vector<1x16xf32> to vector<8x16xf32>
    %116 = arith.mulf %50, %115 : vector<8x16xf32>
    %117 = arith.subf %114, %116 : vector<8x16xf32>
    %118 = arith.mulf %117, %60 : vector<8x16xf32>
    %c80 = arith.constant 80 : index
    %c0_42 = arith.constant 0 : index
    %119 = vector.load %arg7[%c80, %c0_42] : memref<88x16xf32, #tpu.memory_space<vmem>>, vector<8x16xf32>
    tpu.vector_store %arg7[%c80, %c0_42], %118 {strides = array<i32>} : memref<88x16xf32, #tpu.memory_space<vmem>>, vector<8x16xf32>,
    %c0_43 = arith.constant 0 : index
    %c0_44 = arith.constant 0 : index
    %120 = vector.load %arg7[%c0_43, %c0_44] : memref<88x16xf32, #tpu.memory_space<vmem>>, vector<88x16xf32>
    %cst_45 = arith.constant dense<0.000000e+00> : vector<32x16xf32>
    %121 = tpu.matmul %2, %120, %cst_45 {dimension_numbers = #tpu.dot_dimension_numbers<[1], [0], [0], [1], [0, 0, 1, 1], [], []>} : vector<32x88xf32>, vector<88x16xf32>, vector<32x16xf32> -> vector<32x16xf32>
    %122 = vector.extract_strided_slice %121 {offsets = [0, 0], sizes = [8, 16], strides = [1, 1]} : vector<32x16xf32> to vector<8x16xf32>
    %123 = vector.broadcast %8 : vector<8x1xf32> to vector<8x16xf32>
    %124 = arith.addf %122, %123 : vector<8x16xf32>
    %125 = vector.extract_strided_slice %121 {offsets = [8, 0], sizes = [24, 16], strides = [1, 1]} : vector<32x16xf32> to vector<24x16xf32>
    %cst_46 = arith.constant dense<0.000000e+00> : vector<16xf32>
    %126 = vector.multi_reduction <add>, %124, %cst_46 [0] : vector<8x16xf32> to vector<16xf32>
    %127 = vector.shape_cast %126 : vector<16xf32> to vector<1x16xf32>
    %cst_47 = arith.constant 8.000000e+00 : f32
    %128 = vector.broadcast %cst_47 : f32 to vector<1x16xf32>
    %129 = arith.divf %127, %128 : vector<1x16xf32>
    %130 = vector.broadcast %129 : vector<1x16xf32> to vector<8x16xf32>
    %131 = arith.subf %124, %130 : vector<8x16xf32>
    %132 = arith.mulf %131, %131 : vector<8x16xf32>
    %cst_48 = arith.constant dense<0.000000e+00> : vector<16xf32>
    %133 = vector.multi_reduction <add>, %132, %cst_48 [0] : vector<8x16xf32> to vector<16xf32>
    %134 = vector.shape_cast %133 : vector<16xf32> to vector<1x16xf32>
    %cst_49 = arith.constant 8.000000e+00 : f32
    %135 = vector.broadcast %cst_49 : f32 to vector<1x16xf32>
    %136 = arith.divf %134, %135 : vector<1x16xf32>
    %cst_50 = arith.constant 9.99999974E-6 : f32
    %137 = vector.broadcast %cst_50 : f32 to vector<1x16xf32>
    %138 = arith.addf %136, %137 : vector<1x16xf32>
    %139 = math.rsqrt %138 : vector<1x16xf32>
    %140 = vector.broadcast %139 : vector<1x16xf32> to vector<8x16xf32>
    %141 = arith.mulf %131, %140 : vector<8x16xf32>
    %142 = vector.broadcast %9 : vector<8x1xf32> to vector<8x16xf32>
    %143 = arith.mulf %141, %142 : vector<8x16xf32>
    %144 = vector.broadcast %10 : vector<8x1xf32> to vector<8x16xf32>
    %145 = arith.addf %143, %144 : vector<8x16xf32>
    %146 = arith.mulf %125, %125 : vector<24x16xf32>
    %cst_51 = arith.constant dense<0.000000e+00> : vector<16xf32>
    %147 = vector.multi_reduction <add>, %146, %cst_51 [0] : vector<24x16xf32> to vector<16xf32>
    %148 = vector.shape_cast %147 : vector<16xf32> to vector<1x16xf32>
    %cst_52 = arith.constant 2.400000e+01 : f32
    %149 = vector.broadcast %cst_52 : f32 to vector<1x16xf32>
    %150 = arith.divf %148, %149 : vector<1x16xf32>
    %cst_53 = arith.constant 9.99999974E-6 : f32
    %151 = vector.broadcast %cst_53 : f32 to vector<1x16xf32>
    %152 = arith.addf %150, %151 : vector<1x16xf32>
    %153 = math.rsqrt %152 : vector<1x16xf32>
    %154 = vector.broadcast %153 : vector<1x16xf32> to vector<24x16xf32>
    %155 = vector.broadcast %11 : vector<24x1xf32> to vector<24x16xf32>
    %156 = arith.mulf %154, %155 : vector<24x16xf32>
    %157 = arith.mulf %125, %156 : vector<24x16xf32>
    %158 = tpu.concatenate %145, %157 in 0 : vector<8x16xf32>, vector<24x16xf32> -> vector<32x16xf32>
    %159 = tpu.transpose %158, [1, 0] : vector<32x16xf32> -> vector<16x32xf32>
    %c0_54 = arith.constant 0 : index
    %c0_55 = arith.constant 0 : index
    %160 = vector.load %arg6[%c0_54, %c0_55] : memref<16x32xf32, #tpu.memory_space<vmem>>, vector<16x32xf32>
    tpu.vector_store %arg6[%c0_54, %c0_55], %159 {strides = array<i32>} : memref<16x32xf32, #tpu.memory_space<vmem>>, vector<16x32xf32>,
    return
  }
  func.func @transform_0(%arg0: i32) -> (i32, i32) {
    %c0_i32 = arith.constant 0 : i32
    %c0_i32_0 = arith.constant 0 : i32
    return %arg0, %c0_i32 : i32, i32
  }
  func.func @transform_1(%arg0: i32) -> (i32, i32) {
    %c0_i32 = arith.constant 0 : i32
    %c0_i32_0 = arith.constant 0 : i32
    return %c0_i32, %arg0 : i32, i32
  }
  func.func @transform_2(%arg0: i32) -> (i32, i32) {
    %c0_i32 = arith.constant 0 : i32
    %c0_i32_0 = arith.constant 0 : i32
    return %arg0, %c0_i32 : i32, i32
  }
  func.func @transform_3(%arg0: i32) -> (i32, i32) {
    %c0_i32 = arith.constant 0 : i32
    %c0_i32_0 = arith.constant 0 : i32
    %c0_i32_1 = arith.constant 0 : i32
    return %c0_i32, %c0_i32_0 : i32, i32
  }
  func.func @transform_4(%arg0: i32) -> (i32, i32) {
    %c0_i32 = arith.constant 0 : i32
    %c0_i32_0 = arith.constant 0 : i32
    %c0_i32_1 = arith.constant 0 : i32
    return %c0_i32, %c0_i32_0 : i32, i32
  }
  func.func @transform_5(%arg0: i32) -> (i32, i32) {
    %c0_i32 = arith.constant 0 : i32
    %c0_i32_0 = arith.constant 0 : i32
    return %arg0, %c0_i32 : i32, i32
  }
}

</mosaic_0001>

<bundles_post_ra>
// kernel: tpu_custom_call.1
= control target key start
LH: loop header
LB: loop body
LE: loop exit
PB: predicated region body
PF: predicated region fallthrough
CT: control target
= control target key end

     0   :  { %vm86_vm0 = vcmask 261120   ;;  %v1065_v5 = vmov 0   ;;  %s1324_s0 = inlined_call_operand.vmem [shape: f32[16,32], index: 0, kind: input, shape index: {}]   ;;  %s1325_s1 = inlined_call_operand.vmem [shape: f32[4,16], index: 1, kind: input, shape index: {}]   ;;  %s1326_s2 = inlined_call_operand.vmem [shape: f32[16,32], index: 2, kind: input, shape index: {}]   ;;  %s1327_s3 = inlined_call_operand.vmem [shape: f32[136,88], index: 3, kind: input, shape index: {}]   ;;  %s1328_s4 = inlined_call_operand.vmem [shape: f32[184,1], index: 4, kind: input, shape index: {}]   ;;  %s1329_s5 = inlined_call_operand.hbm [shape: f32[16,32], index: 5, kind: output, shape index: {}]  }
   0x1   :  { %v63_v0 = vld [vmem:[%s1326_s2] sm:$0xff]  ;;  %v64_v1 = vld [vmem:[%s1326_s2 + $0x8] sm:$0xff]  ;;  %vm1113_vm1 = vmpackc.low %vm86_vm0, %vm86_vm0  ;;  %1017 = vset.pattern.permute.xlu0 %v1065_v5  ;;  %1018 = vset.pattern.permute.xlu1 %v1065_v5 }
   0x2   :  { %v21_v2 = vld [vmem:[%s1327_s3] sm:$0xff]  ;;  %v972_v3 = vpack.c.bf16 %v64_v1, %v63_v0  ;;  %v40_v7 = vld [vmem:[%s1328_s4 + $0x10] sm:$0xff]  ;;  %v39_v8 = vld [vmem:[%s1328_s4 + $0x8] sm:$0xff] }
   0x3   :  { %905 = vmatprep.mubr.msk.f32.mxu0 %vm86_vm0, %v21_v2  ;;  %v38_v6 = vld [vmem:[%s1328_s4] sm:$0xff]  ;;  %78 = vperm.xlu1 %1018, %v40_v7   ;;  %v41_v9 = vld [vmem:[%s1328_s4 + $0x18] sm:$0xff]  ;;  %v22_v10 = vld [vmem:[%s1327_s3 + $0x8] sm:$0xff] }
   0x4   :  { %974 = vmatprep.subr.msk.bf16.mxu0 %vm1113_vm1, %v972_v3  ;;  %68 = vperm.xlu0 %1017, %v38_v6   ;;  %v42_v11 = vld [vmem:[%s1328_s4 + $0x20] sm:$0xff]  ;;  %v23_v12 = vld [vmem:[%s1327_s3 + $0x10] sm:$0xff]  ;;  %v43_v13 = vld [vmem:[%s1328_s4 + $0x28] sm:$0xff] }
   0x5   :  { %977 = vmatpush3.bf16.xpose.msk.msra.mxu0 %vm1113_vm1, %v972_v3 }
   0x7   :  { %83 = vperm.xlu1 %1018, %v41_v9  }
   0x8   :  { %73 = vperm.xlu0 %1017, %v39_v8  }
   0x9   :  { %10 = vsyncpa [#allocation4], 0  ;;  %v24_v14 = vld [vmem:[%s1327_s3 + $0x18] sm:$0xff]  ;;  %v46_v15 = vld [vmem:[%s1328_s4 + $0x40] sm:$0xff]  ;;  %v1066_v35 = vmov 0.0|0.0   ;;  %vm1067_vm2 = vmmov 0  }
   0xa   :  { %v47_v16 = vld [vmem:[%s1328_s4 + $0x48] sm:$0xff]  ;;  %v44_v17 = vld [vmem:[%s1328_s4 + $0x30] sm:$0xff]  ;;  %v45_v18 = vld [vmem:[%s1328_s4 + $0x38] sm:$0xff]  ;;  %978 = vmatprep.subr.bf16.mxu1 %v1066_v35  ;;  %v1068_v38 = vmov 0.0   ;;  %vm190_vm3 = vcmask 130048   ;;  %vm613_vm4 = vcmask 719872  }
   0xb   :  { %241 = vperm.xlu1 %1018, %v43_v13   ;;  %v48_v19 = vld [vmem:[%s1328_s4 + $0x50] sm:$0xff]  ;;  %v49_v20 = vld [vmem:[%s1328_s4 + $0x58] sm:$0xff]  ;;  %v50_v21 = vld [vmem:[%s1328_s4 + $0x60] sm:$0xff]  ;;  %919 = vmatprep.mubr.msk.f32.mxu1 %vm1067_vm2, %v1068_v38 }
   0xc   :  { %906 = vmatmul.mubr.msk.f32.vlgmr.msra.gmra.mrb[0].mxu0 %vm86_vm0, %v22_v10  ;;  %236 = vperm.xlu0 %1017, %v42_v11   ;;  %v53_v22 = vld [vmem:[%s1328_s4 + $0x78] sm:$0xff]  ;;  %v51_v23 = vld [vmem:[%s1328_s4 + $0x68] sm:$0xff]  ;;  %v52_v24 = vld [vmem:[%s1328_s4 + $0x70] sm:$0xff] }
   0xd   :  { %908 = vmatprep.mubr.msk.f32.mxu0 %vm86_vm0, %v23_v12  ;;  %v54_v25 = vld [vmem:[%s1328_s4 + $0x80] sm:$0xff]  ;;  %v55_v26 = vld [vmem:[%s1328_s4 + $0x88] sm:$0xff]  ;;  %v56_v27 = vld [vmem:[%s1328_s4 + $0x90] sm:$0xff] }
   0xe   :  { %v57_v28 = vld [vmem:[%s1328_s4 + $0x98] sm:$0xff]  ;;  %v58_v29 = vld [vmem:[%s1328_s4 + $0xa0] sm:$0xff]  ;;  %v59_v30 = vld [vmem:[%s1328_s4 + $0xa8] sm:$0xff] }
   0xf   :  { %265 = vperm.xlu1 %1018, %v47_v16   ;;  %v60_v31 = vld [vmem:[%s1328_s4 + $0xb0] sm:$0xff]  ;;  %v61_v32 = vld [vmem:[%s1324_s0] sm:$0xff]  ;;  %v62_v33 = vld [vmem:[%s1324_s0 + $0x8] sm:$0xff] }
  0x10   :  { %909 = vmatmul.mubr.msk.f32.gmra.mrb[2].mxu0 %vm86_vm0, %v24_v14  ;;  %260 = vperm.xlu0 %1017, %v46_v15   ;;  %v984_v34 = vpack.c.bf16 %v62_v33, %v61_v32  ;;  %v34_v36 = vld [vmem:[%s1327_s3 + $0x68] sm:$0xff]  ;;  %v35_v37 = vld [vmem:[%s1327_s3 + $0x70] sm:$0xff]  ;;  %v36_v39 = vld [vmem:[%s1327_s3 + $0x78] sm:$0xff] }
  0x11   :  { %938 = vmatprep.mubr.msk.f32.mxu0 %vm86_vm0, %v34_v36  ;;  %v37_v40 = vld [vmem:[%s1327_s3 + $0x80] sm:$0xff] }
  0x12   :  { %986 = vmatprep.subr.msk.bf16.mxu0 %vm1113_vm1, %v984_v34 }
  0x13   :  { %251 = vperm.xlu1 %1018, %v45_v18   ;;  %989 = vmatpush3.bf16.xpose.msk.msra.mxu0 %vm1113_vm1, %v984_v34 }
  0x14   :  { %246 = vperm.xlu0 %1017, %v44_v17  }
  0x17   :  { %275 = vperm.xlu1 %1018, %v49_v20  }
  0x18   :  { %270 = vperm.xlu0 %1017, %v48_v19  }
  0x1a   :  { %939 = vmatmul.mubr.msk.f32.vlgmr.msra.gmra.mrb[4].mxu0 %vm86_vm0, %v35_v37 }
  0x1b   :  { %327 = vperm.xlu1 %1018, %v53_v22   ;;  %941 = vmatprep.mubr.msk.f32.mxu0 %vm86_vm0, %v36_v39 }
  0x1c   :  { %312 = vperm.xlu0 %1017, %v50_v21  }
  0x1e   :  { %942 = vmatmul.mubr.msk.f32.gmra.mrb[6].mxu0 %vm86_vm0, %v37_v40 }
  0x1f   :  { %322 = vperm.xlu1 %1018, %v52_v24  }
  0x20   :  { %317 = vperm.xlu0 %1017, %v51_v23  }
  0x23   :  { %713 = vperm.xlu1 %1018, %v55_v26  }
  0x24   :  { %332 = vperm.xlu0 %1017, %v54_v25  }
  0x27   :  { %747 = vperm.xlu1 %1018, %v57_v28  }
  0x28   :  { %741 = vperm.xlu0 %1017, %v56_v27  }
  0x2b   :  { %776 = vperm.xlu1 %1018, %v59_v30  }
  0x2c   :  { %771 = vperm.xlu0 %1017, %v58_v29  }
  0x30   :  { %781 = vperm.xlu0 %1017, %v60_v31  }
  0x82   :  { %v79_v42 = vpop.permute.xlu1 %78 }
  0x83   :  { %v69_v41 = vpop.permute.xlu0 %68 }
  0x86   :  { %v84_v51 = vpop.permute.xlu1 %83 }
  0x87   :  { %v74_v43 = vpop.permute.xlu0 %73 }
  0x8a   :  { %v242_v25 = vpop.permute.xlu1 %241 }
  0x8b   :  { %v237_v24 = vpop.permute.xlu0 %236 }
  0x8e   :  { %v266_v29 = vpop.permute.xlu1 %265 }
  0x8f   :  { %v261_v28 = vpop.permute.xlu0 %260 }
  0x92   :  { %v252_v31 = vpop.permute.xlu1 %251 }
  0x93   :  { %v247_v30 = vpop.permute.xlu0 %246 }
  0xdf   :  { %v907_v44 = vpop.f32.mrb[0].mxu0 }
  0xe0   :  { %v177_v45 = vadd.f32 %v907_v44, %v74_v43  ;;  %v171_v46 = vpop.f32.mrb[1].mxu0  ;;  %v271_v43 = vpop.permute.xlu0 %270 }
  0xe1   :  { %v172_v47 = vadd.f32 %v171_v46, %v69_v41  ;;  %v276_v44 = vpop.permute.xlu1 %275 }
  0xe2   :  { %v192_v48 = vsel %vm190_vm3, %v177_v45, 0.0 }
  0xe3   :  { %v191_v49 = vsel %vm190_vm3, %v172_v47, 0.0  ;;  %v910_v50 = vpop.f32.mrb[2].mxu0 }
  0xe4   :  { %v193_v52 = vadd.f32 %v192_v48, %v191_v49  ;;  %v181_v53 = vpop.f32.mrb[3].mxu0  ;;  %v187_v54 = vadd.f32 %v910_v50, %v84_v51 }
  0xe5   :  { %v182_v55 = vadd.f32 %v181_v53, %v79_v42 }
  0xe6   :  { %v196_v58 = vsel %vm190_vm3, %v187_v54, 0.0 }
  0xe7   :  { %v194_v56 = vsel %vm190_vm3, %v182_v55, 0.0 }
  0xe8   :  { %v195_v57 = vadd.f32 %v194_v56, %v193_v52 }
  0xea   :  { %v197_v59 = vadd.f32 %v196_v58, %v195_v57 }
  0xec   :  { %v198_v60 = vrot.slane %v197_v59, 4 }
  0xee   :  { %v199_v61 = vadd.f32 %v198_v60, %v197_v59 }
  0xf0   :  { %v200_v62 = vrot.slane %v199_v61, 2 }
  0xf2   :  { %v201_v63 = vadd.f32 %v200_v62, %v199_v61 }
  0xf4   :  { %v202_v0 = vrot.slane %v201_v63, 1 }
  0xf6   :  { %v203_v1 = vadd.f32 %v202_v0, %v201_v63 }
  0xf8   :  { %v205_v2 = vmul.f32 0.03125, %v203_v1 }
  0xfa   :  { %v206_v3 = vsub.f32 %v172_v47, %v205_v2  ;;  %v207_v4 = vsub.f32 %v177_v45, %v205_v2  ;;  %v208_v5 = vsub.f32 %v182_v55, %v205_v2  ;;  %v209_v6 = vsub.f32 %v187_v54, %v205_v2 }
  0xfc   :  { %v210_v7 = vmul.f32 %v206_v3, %v206_v3  ;;  %v211_v8 = vmul.f32 %v207_v4, %v207_v4  ;;  %v212_v9 = vmul.f32 %v208_v5, %v208_v5  ;;  %v213_v10 = vmul.f32 %v209_v6, %v209_v6 }
  0xfe   :  { %v214_v11 = vsel %vm190_vm3, %v210_v7, 0.0  ;;  %v215_v12 = vsel %vm190_vm3, %v211_v8, 0.0  ;;  %v217_v14 = vsel %vm190_vm3, %v212_v9, 0.0  ;;  %v219_v16 = vsel %vm190_vm3, %v213_v10, 0.0  ;;  %v25_v7 = vld [vmem:[%s1327_s3 + $0x20] sm:$0xff]  ;;  %v26_v8 = vld [vmem:[%s1327_s3 + $0x28] sm:$0xff] }
  0xff   :  { %v216_v13 = vadd.f32 %v215_v12, %v214_v11  ;;  %v28_v9 = vld [vmem:[%s1327_s3 + $0x38] sm:$0xff]  ;;  %v29_v10 = vld [vmem:[%s1327_s3 + $0x40] sm:$0xff]  ;;  %v543_v11 = vlaneseq }
 0x101   :  { %v218_v15 = vadd.f32 %v217_v14, %v216_v13  ;;  %v544_v12 = vshrl.u32 %v543_v11, 7 }
 0x103   :  { %v220_v17 = vadd.f32 %v219_v16, %v218_v15  ;;  %v552_v13 = vsub.s32 1, %v544_v12  ;;  %v563_v14 = vsub.s32 3, %v544_v12  ;;  %v557_v15 = vsub.s32 2, %v544_v12  ;;  %v65_v16 = vld [vmem:[%s1325_s1] sm:$0xf] }
 0x105   :  { %v221_v18 = vrot.slane %v220_v17, 4 }
 0x107   :  { %v222_v19 = vadd.f32 %v221_v18, %v220_v17  ;;  %v940_v17 = vpop.f32.mrb[4].mxu0  ;;  %v553_v18 = vrot.slane %v65_v16, %v552_v13 }
 0x109   :  { %v223_v20 = vrot.slane %v222_v19, 2 }
 0x10b   :  { %v224_v21 = vadd.f32 %v223_v20, %v222_v19  ;;  %v564_v19 = vrot.slane %v65_v16, %v563_v14  ;;  %v558_v20 = vrot.slane %v65_v16, %v557_v15 }
 0x10d   :  { %v225_v22 = vrot.slane %v224_v21, 1 }
 0x10f   :  { %v226_v23 = vadd.f32 %v225_v22, %v224_v21  ;;  %v554_v21 = vmul.f32 %v940_v17, %v553_v18  ;;  %v1272_v22 = vmul.f32 %v940_v17, %v564_v19 }
 0x111   :  { %v227_v26 = vmul.f32 0.03125, %v226_v23 }
 0x113   :  { %v228_v27 = vadd.f32 1e-05, %v227_v26 }
 0x115   :  { %1019 = vrsqrt.f32 %v228_v27 }
 0x11f   :  { %v1020_v32 = vpop.eup %1019 }
 0x120   :  { %v232_v33 = vmul.f32 %v1020_v32, %v208_v5  ;;  %v230_v34 = vmul.f32 %v1020_v32, %v206_v3  ;;  %v231_v36 = vmul.f32 %v1020_v32, %v207_v4  ;;  %v233_v37 = vmul.f32 %v1020_v32, %v209_v6 }
 0x122   :  { %v256_v39 = vmul.f32 %v247_v30, %v232_v33  ;;  %v254_v40 = vmul.f32 %v237_v24, %v230_v34  ;;  %v255_v41 = vmul.f32 %v242_v25, %v231_v36  ;;  %v257_v42 = vmul.f32 %v252_v31, %v233_v37 }
 0x123   :  { %v1274_v24 = vmul.f32 %v940_v17, %v558_v20 }
 0x124   :  { %v278_v45 = vadd.f32 %v261_v28, %v254_v40  ;;  %v279_v46 = vadd.f32 %v266_v29, %v255_v41  ;;  %v280_v47 = vadd.f32 %v271_v43, %v256_v39  ;;  %v281_v48 = vadd.f32 %v276_v44, %v257_v42  ;;  %v30_v39 = vld [vmem:[%s1327_s3 + $0x48] sm:$0xff]  ;;  %v313_v42 = vpop.permute.xlu0 %312 }
 0x125   :  { %v545_v40 = vsub.s32 0, %v544_v12 }
 0x126   :  { %v846_v49 = vmul.f32 -1.442695, %v278_v45  ;;  %v847_v50 = vmul.f32 -1.442695, %v279_v46  ;;  %v848_v51 = vmul.f32 -1.442695, %v280_v47 }
 0x127   :  { %v849_v52 = vmul.f32 -1.442695, %v281_v48  ;;  %v546_v41 = vrot.slane %v65_v16, %v545_v40 }
 0x128   :  { %1021 = vpow2.f32 %v846_v49 }
 0x129   :  { %1023 = vpow2.f32 %v847_v50 }
 0x12a   :  { %1025 = vpow2.f32 %v848_v51 }
 0x12b   :  { %1027 = vpow2.f32 %v849_v52  ;;  %v318_v52 = vpop.permute.xlu0 %317 }
 0x132   :  { %v1022_v53 = vpop.eup %1021 }
 0x133   :  { %v1024_v54 = vpop.eup %1023  ;;  %v294_v55 = vadd.f32 1.0, %v1022_v53 }
 0x134   :  { %v1026_v56 = vpop.eup %1025  ;;  %v295_v57 = vadd.f32 1.0, %v1024_v54 }
 0x135   :  { %v1028_v58 = vpop.eup %1027  ;;  %1029 = vrcp.f32 %v294_v55  ;;  %v296_v59 = vadd.f32 1.0, %v1026_v56 }
 0x136   :  { %1031 = vrcp.f32 %v295_v57  ;;  %v297_v60 = vadd.f32 1.0, %v1028_v58 }
 0x137   :  { %1033 = vrcp.f32 %v296_v59 }
 0x138   :  { %1035 = vrcp.f32 %v297_v60 }
 0x13f   :  { %v1030_v61 = vpop.eup %1029 }
 0x140   :  { %v1032_v62 = vpop.eup %1031  ;;  %v306_v63 = vmul.f32 %v1030_v61, %v278_v45 }
 0x141   :  { %v1034_v0 = vpop.eup %1033  ;;  %v307_v1 = vmul.f32 %v1032_v62, %v279_v46 }
 0x142   :  { %v1036_v2 = vpop.eup %1035  ;;  %v308_v3 = vmul.f32 %v1034_v0, %v280_v47  ;;  %v328_v47 = vpop.permute.xlu1 %327 }
 0x143   :  { %v979_v4 = vpack.c.bf16 %v307_v1, %v306_v63  ;;  %v309_v5 = vmul.f32 %v1036_v2, %v281_v48  ;;  %v572_v63 = vmul.f32 %v940_v17, %v546_v41 }
 0x145   :  { %980 = vmatpush3.bf16.msra.mxu1 %v979_v4  ;;  %v982_v6 = vpack.c.bf16 %v309_v5, %v308_v3 }
 0x146   :  { %981 = vmatprep.subr.bf16.mxu1 %v1066_v35  ;;  %v27_v35 = vld [vmem:[%s1327_s3 + $0x30] sm:$0xff]  ;;  %v323_v61 = vpop.permute.xlu1 %322 }
 0x149   :  { %983 = vmatpush3.bf16.msra.mxu1 %v982_v6 }
 0x14c   :  { %920 = vmatmul.mubr.msk.f32.vlgmr.msra.gmra.mrb[0].mxu1 %vm86_vm0, %v25_v7 }
 0x14d   :  { %922 = vmatprep.mubr.msk.f32.mxu1 %vm1067_vm2, %v1068_v38 }
 0x150   :  { %923 = vmatmul.mubr.msk.f32.gmra.mrb[2].mxu1 %vm86_vm0, %v26_v8 }
 0x151   :  { %925 = vmatprep.mubr.msk.f32.mxu1 %vm1067_vm2, %v1068_v38 }
 0x154   :  { %926 = vmatmul.mubr.msk.f32.gmra.mrb[4].mxu1 %vm86_vm0, %v27_v35  ;;  %v333_v35 = vpop.permute.xlu0 %332 }
 0x155   :  { %928 = vmatprep.mubr.msk.f32.mxu1 %vm1067_vm2, %v1068_v38 }
 0x158   :  { %929 = vmatmul.mubr.msk.f32.gmra.mrb[6].mxu1 %vm86_vm0, %v28_v9 }
 0x159   :  { %931 = vmatprep.mubr.msk.f32.mxu1 %vm1067_vm2, %v1068_v38  ;;  %v524_v38 = vpop.f32.mrb[5].mxu0 }
 0x15a   :  { %v943_v23 = vpop.f32.mrb[6].mxu0  ;;  %v547_v43 = vmul.f32 %v546_v41, %v524_v38  ;;  %v569_v49 = vmul.f32 %v553_v18, %v524_v38  ;;  %v580_v50 = vmul.f32 %v558_v20, %v524_v38  ;;  %v591_v51 = vmul.f32 %v564_v19, %v524_v38 }
 0x15b   :  { %v534_v25 = vpop.f32.mrb[7].mxu0  ;;  %v565_v26 = vmul.f32 %v943_v23, %v564_v19  ;;  %v576_v27 = vmul.f32 %v943_v23, %v558_v20  ;;  %v586_v28 = vmul.f32 %v943_v23, %v553_v18  ;;  %v594_v56 = vmul.f32 %v943_v23, %v546_v41 }
 0x15c   :  { %932 = vmatmul.mubr.msk.f32.gmra.mrb[8].mxu1 %vm86_vm0, %v29_v10  ;;  %v559_v29 = vmul.f32 %v558_v20, %v534_v25  ;;  %v575_v30 = vmul.f32 %v564_v19, %v534_v25  ;;  %v598_v31 = vmul.f32 %v553_v18, %v534_v25  ;;  %v583_v57 = vmul.f32 %v546_v41, %v534_v25 }
 0x15d   :  { %v588_v33 = vsub.f32 %v586_v28, %v1272_v22  ;;  %966 = vmatprep.mubr.msk.f32.mxu1 %vm613_vm4, %v30_v39 }
 0x15e   :  { %v560_v32 = vadd.f32 %v559_v29, %v554_v21  ;;  %v577_v34 = vsub.f32 %v575_v30, %v576_v27  ;;  %v599_v36 = vsub.f32 %v1274_v24, %v598_v31  ;;  %v31_v30 = vld [vmem:[%s1327_s3 + $0x50] sm:$0xff]  ;;  %v32_v31 = vld [vmem:[%s1327_s3 + $0x58] sm:$0xff] }
 0x160   :  { %v566_v37 = vadd.f32 %v565_v26, %v560_v32  ;;  %v33_v32 = vld [vmem:[%s1327_s3 + $0x60] sm:$0xff]  ;;  %s1069_s3 = smov [#allocation3]  }
 0x161   :  { %s829_s26 = sshll.u32 %s1069_s3, 4  ;;  %s830_s26 = int_to_ptr.vmem [resolvable:$true] %s829_s26 }
 0x162   :  { %s1041_s4 = scalar_lea.vmem %s830_s26, 256  ;;  %p1046_p1 = scmp.lt.s32.totalorder %s830_s26, %s830_s26 }
 0x163   :  { %p1042_p0 = scmp.ne.s32.totalorder %s830_s26, %s1041_s4  ;;  %p1047_p2 = scmp.lt.s32.totalorder %s1041_s4, %s1041_s4 }
 0x165   :  { %p1048_p3 = por %p1047_p2, %p1046_p1 }
 0x167   :  { %p1049_p4 = pnand %p1048_p3, %p1042_p0 }
 0x21f   :  { %v416_v44 = vpop.f32.mrb[0].mxu1 }
 0x220   :  { %v417_v45 = vadd.f32 %v416_v44, %v313_v42  ;;  %v921_v46 = vpop.f32.mrb[1].mxu1 }
 0x222   :  { %v548_v48 = vmul.f32 %v547_v43, %v417_v45 }
 0x223   :  { %v421_v53 = vpop.f32.mrb[2].mxu1 }
 0x224   :  { %549 = vst.msk [vmem:[#allocation2] sm:$0xff] %vm190_vm3, %v548_v48  ;;  %v422_v54 = vadd.f32 %v421_v53, %v318_v52  ;;  %v924_v55 = vpop.f32.mrb[3].mxu1 }
 0x226   :  { %v570_v58 = vmul.f32 %v569_v49, %v422_v54  ;;  %v581_v59 = vmul.f32 %v580_v50, %v422_v54  ;;  %v592_v60 = vmul.f32 %v591_v51, %v422_v54 }
 0x227   :  { %v426_v62 = vpop.f32.mrb[4].mxu1 }
 0x228   :  { %571 = vst.msk [vmem:[#allocation2 + $0x10] sm:$0xff] %vm190_vm3, %v570_v58  ;;  %582 = vst.msk [vmem:[#allocation2 + $0x28] sm:$0xff] %vm190_vm3, %v581_v59  ;;  %v427_v0 = vadd.f32 %v426_v62, %v323_v61  ;;  %v927_v1 = vpop.f32.mrb[5].mxu1 }
 0x229   :  { %593 = vst.msk [vmem:[#allocation2 + $0x40] sm:$0xff] %vm190_vm3, %v592_v60 }
 0x22a   :  { %v573_v2 = vmul.f32 %v572_v63, %v427_v0  ;;  %v584_v3 = vmul.f32 %v583_v57, %v427_v0  ;;  %v595_v4 = vmul.f32 %v594_v56, %v427_v0 }
 0x22b   :  { %v431_v5 = vpop.f32.mrb[6].mxu1  ;;  %v602_v15 = vld [vmem:[#allocation2] sm:$0xff] }
 0x22c   :  { %574 = vst.msk [vmem:[#allocation2 + $0x18] sm:$0xff] %vm190_vm3, %v573_v2  ;;  %585 = vst.msk [vmem:[#allocation2 + $0x30] sm:$0xff] %vm190_vm3, %v584_v3  ;;  %v432_v6 = vadd.f32 %v431_v5, %v328_v47  ;;  %v930_v7 = vpop.f32.mrb[7].mxu1  ;;  %v742_v5 = vpop.permute.xlu0 %741 }
 0x22d   :  { %596 = vst.msk [vmem:[#allocation2 + $0x48] sm:$0xff] %vm190_vm3, %v595_v4 }
 0x22e   :  { %v567_v8 = vmul.f32 %v566_v37, %v432_v6 }
 0x22f   :  { %v436_v9 = vpop.f32.mrb[8].mxu1  ;;  %v604_v19 = vld [vmem:[#allocation2 + $0x10] sm:$0xff]  ;;  %v607_v21 = vld [vmem:[#allocation2 + $0x28] sm:$0xff] }
 0x230   :  { %568 = vst.msk [vmem:[#allocation2 + $0x8] sm:$0xff] %vm190_vm3, %v567_v8  ;;  %v437_v10 = vadd.f32 %v436_v9, %v333_v35  ;;  %v933_v11 = vpop.f32.mrb[9].mxu1  ;;  %v610_v27 = vld [vmem:[#allocation2 + $0x40] sm:$0xff]  ;;  %v772_v9 = vpop.permute.xlu0 %771 }
 0x232   :  { %v578_v12 = vmul.f32 %v577_v34, %v437_v10  ;;  %v589_v13 = vmul.f32 %v588_v33, %v437_v10  ;;  %v600_v14 = vmul.f32 %v599_v36, %v437_v10  ;;  %v714_v34 = vpop.permute.xlu1 %713 }
 0x233   :  { %v605_v17 = vld [vmem:[#allocation2 + $0x18] sm:$0xff]  ;;  %v608_v24 = vld [vmem:[#allocation2 + $0x30] sm:$0xff] }
 0x234   :  { %579 = vst.msk [vmem:[#allocation2 + $0x20] sm:$0xff] %vm190_vm3, %v578_v12  ;;  %590 = vst.msk [vmem:[#allocation2 + $0x38] sm:$0xff] %vm190_vm3, %v589_v13  ;;  %v994_v20 = vpack.c.bf16 %v605_v17, %v604_v19  ;;  %v611_v26 = vld [vmem:[#allocation2 + $0x48] sm:$0xff] }
 0x235   :  { %601 = vst.msk [vmem:[#allocation2 + $0x50] sm:$0xff] %vm190_vm3, %v600_v14  ;;  %v1006_v28 = vpack.c.bf16 %v611_v26, %v610_v27 }
 0x236   :  { %v748_v10 = vpop.permute.xlu1 %747 }
 0x237   :  { %v603_v16 = vld [vmem:[#allocation2 + $0x8] sm:$0xff] }
 0x238   :  { %v990_v18 = vpack.c.bf16 %v603_v16, %v602_v15  ;;  %v782_v15 = vpop.permute.xlu0 %781 }
 0x23a   :  { %991 = vmatprep.subr.bf16.mxu1 %v990_v18  ;;  %v777_v16 = vpop.permute.xlu1 %776 }
 0x23b   :  { %993 = vmatpush3.bf16.msra.mxu1 %v990_v18  ;;  %v606_v38 = vld [vmem:[#allocation2 + $0x20] sm:$0xff]  ;;  %v609_v23 = vld [vmem:[#allocation2 + $0x38] sm:$0xff] }
 0x23c   :  { %995 = vmatprep.subr.bf16.mxu1 %v994_v20  ;;  %v998_v22 = vpack.c.bf16 %v607_v21, %v606_v38  ;;  %v1002_v25 = vpack.c.bf16 %v609_v23, %v608_v24  ;;  %v612_v29 = vld [vmem:[#allocation2 + $0x50] sm:$0xff] }
 0x23f   :  { %997 = vmatpush3.bf16.msra.mxu1 %v994_v20 }
 0x240   :  { %999 = vmatprep.subr.bf16.mxu1 %v998_v22 }
 0x243   :  { %1001 = vmatpush3.bf16.msra.mxu1 %v998_v22 }
 0x244   :  { %1003 = vmatprep.subr.bf16.mxu1 %v1002_v25 }
 0x247   :  { %1005 = vmatpush3.bf16.msra.mxu1 %v1002_v25 }
 0x248   :  { %1007 = vmatprep.subr.bf16.mxu1 %v1006_v28 }
 0x24b   :  { %1009 = vmatpush3.bf16.msra.mxu1 %v1006_v28 }
 0x24c   :  { %964 = vmatprep.subr.mxu1 %v612_v29 }
 0x24f   :  { %965 = vmatpush3.msra.mxu1 %v612_v29 }
 0x250   :  { %967 = vmatmul.mubr.msk.f32.vlgmr.msra.gmra.mrb[10].mxu1 %vm613_vm4, %v31_v30 }
 0x251   :  { %969 = vmatprep.mubr.msk.f32.mxu1 %vm613_vm4, %v32_v31 }
 0x254   :  { %970 = vmatmul.mubr.msk.f32.gmra.mrb[12].mxu1 %vm613_vm4, %v33_v32 }
 0x323   :  { %v968_v33 = vpop.f32.mrb[10].mxu1 }
 0x324   :  { %v692_v36 = vpop.f32.mrb[11].mxu1  ;;  %v751_v39 = vmul.f32 %v968_v33, %v968_v33 }
 0x325   :  { %v716_v37 = vadd.f32 %v714_v34, %v692_v36 }
 0x326   :  { %v754_v47 = vsel %vm190_vm3, %v751_v39, 0.0 }
 0x327   :  { %v717_v40 = vsel %vm190_vm3, %v716_v37, 0.0  ;;  %v971_v41 = vpop.f32.mrb[12].mxu1 }
 0x328   :  { %v718_v42 = vrot.slane %v717_v40, 4  ;;  %v753_v43 = vmul.f32 %v971_v41, %v971_v41  ;;  %v702_v44 = vpop.f32.mrb[13].mxu1 }
 0x329   :  { %v752_v45 = vmul.f32 %v702_v44, %v702_v44 }
 0x32a   :  { %v719_v46 = vadd.f32 %v718_v42, %v717_v40  ;;  %v757_v48 = vsel %vm190_vm3, %v753_v43, 0.0 }
 0x32b   :  { %v755_v49 = vsel %vm190_vm3, %v752_v45, 0.0 }
 0x32c   :  { %v720_v50 = vrot.slane %v719_v46, 2  ;;  %v756_v51 = vadd.f32 %v755_v49, %v754_v47 }
 0x32e   :  { %v721_v52 = vadd.f32 %v720_v50, %v719_v46  ;;  %v758_v53 = vadd.f32 %v757_v48, %v756_v51 }
 0x330   :  { %v722_v54 = vrot.slane %v721_v52, 1  ;;  %v759_v55 = vrot.slane %v758_v53, 4 }
 0x332   :  { %v723_v56 = vadd.f32 %v722_v54, %v721_v52  ;;  %v760_v57 = vadd.f32 %v759_v55, %v758_v53 }
 0x334   :  { %v725_v58 = vmul.f32 0.125, %v723_v56  ;;  %v761_v59 = vrot.slane %v760_v57, 2 }
 0x336   :  { %v726_v60 = vsub.f32 %v716_v37, %v725_v58  ;;  %v762_v61 = vadd.f32 %v761_v59, %v760_v57 }
 0x338   :  { %v727_v62 = vmul.f32 %v726_v60, %v726_v60  ;;  %v763_v63 = vrot.slane %v762_v61, 1 }
 0x33a   :  { %v728_v0 = vsel %vm190_vm3, %v727_v62, 0.0  ;;  %v764_v1 = vadd.f32 %v763_v63, %v762_v61 }
 0x33b   :  { %v729_v2 = vrot.slane %v728_v0, 4 }
 0x33c   :  { %v766_v3 = vmul.f32 0.041666668, %v764_v1 }
 0x33d   :  { %v730_v4 = vadd.f32 %v729_v2, %v728_v0 }
 0x33e   :  { %v767_v6 = vadd.f32 1e-05, %v766_v3 }
 0x33f   :  { %v731_v7 = vrot.slane %v730_v4, 2 }
 0x340   :  { %1037 = vrsqrt.f32 %v767_v6 }
 0x341   :  { %v732_v8 = vadd.f32 %v731_v7, %v730_v4 }
 0x343   :  { %v733_v35 = vrot.slane %v732_v8, 1 }
 0x345   :  { %v734_v11 = vadd.f32 %v733_v35, %v732_v8 }
 0x347   :  { %v735_v12 = vmul.f32 0.125, %v734_v11 }
 0x349   :  { %v736_v13 = vadd.f32 1e-05, %v735_v12 }
 0x34a   :  { %v1038_v14 = vpop.eup %1037 }
 0x34b   :  { %1039 = vrsqrt.f32 %v736_v13  ;;  %v785_v17 = vmul.f32 %v1038_v14, %v777_v16  ;;  %v784_v18 = vmul.f32 %v1038_v14, %v772_v9  ;;  %v786_v19 = vmul.f32 %v1038_v14, %v782_v15 }
 0x34d   :  { %v788_v20 = vmul.f32 %v785_v17, %v702_v44  ;;  %v787_v38 = vmul.f32 %v968_v33, %v784_v18  ;;  %v789_v21 = vmul.f32 %v971_v41, %v786_v19 }
 0x355   :  { %v1040_v22 = vpop.eup %1039 }
 0x356   :  { %v738_v23 = vmul.f32 %v1040_v22, %v726_v60 }
 0x358   :  { %v744_v24 = vmul.f32 %v742_v5, %v738_v23 }
 0x35a   :  { %v750_v25 = vadd.f32 %v748_v10, %v744_v24 }
 0x35c   :  { %790 = vxpose.xlu1.b32.start [1/4] (short) (narrow) %v750_v25, 16 }
 0x360   :  { %791 = vxpose.xlu1.b32.cont [2/4] (short) (narrow) %v787_v38, 16 }
 0x364   :  { %792 = vxpose.xlu1.b32.cont [3/4] (short) (narrow) %v788_v20, 16 }
 0x368   :  { %793 = vxpose.xlu1.b32.end [4/4] (short) (narrow) %v789_v21, 16 }
 0x3dc   :  { %v806_v26 = vpop.trf.xlu1 }
 0x3dd   :  { %822 = vst.msk [vmem:[#allocation3] sm:$0xff] %vm86_vm0, %v806_v26 }
 0x3e0   :  { %v807_v27 = vpop.trf.xlu1 }
 0x3e1   :  { %823 = vst.msk [vmem:[#allocation3 + $0x8] sm:$0xff] %vm86_vm0, %v807_v27 }
 0x3e2   :  { %1052 = shalt.err (!%p1049_p4)
}
 0x3e3   :  { %s1053_s29 = scalar_lea.hbm %s1329_s5, 256 }
 0x3e4   :  { %p1054_p5 = scmp.ne.s32.totalorder %s1329_s5, %s1053_s29  ;;  %p1057_p6 = scmp.lt.u32.totalorder %s1053_s29, %s1329_s5 }
 0x3e6   :  { %p1059_p7 = pnand %p1057_p6, %p1054_p5 }
 0x3e8   :  { %1062 = shalt.err (!%p1059_p7)
}
 0x3e9   :  { %s1070_s8 = smov 128   ;;  %s1071_s9 = smov 8  }
 0x3ea   :  { %835 = dma.vmem_to_hbm [thread:$0]  %s830_s26, 256, %s1329_s5, [#allocation4], %s1070_s8, %s1070_s8, %s1071_s9  }
 0x3eb   :  { %1063 = dma.done.wait [#allocation4], 256  }
 0x3ec   :  { %1064 = vsyncadd [#allocation4], 4294967040 }
 0x3ed   :  { %839 = vsyncpa [#allocation4], 1 }

</bundles_post_ra>
